<compile_context>
chip_gen: v5e
topology: v5e:2x2
jax: 0.10.0
libtpu: 0.0.40
codegen_flags: <defaults>
</compile_context>

<pallas_src>
import functools

import jax
import jax.numpy as jnp
from jax import lax
from jax.experimental import pallas as pl
from jax.experimental.pallas import tpu as pltpu


_STEP_TARGET_BYTES = 1 << 20   # aim >=1 MiB moved per grid step (~0.35us fixed cost/step)
_LANE = 128
_SUBLANE = 8


def _largest_divisor_leq(n, k):
    k = max(1, min(int(n), int(k)))
    for d in range(k, 0, -1):
        if n % d == 0:
            return d
    return 1


def _vmem_budget():
    """(tile budget bytes, vmem_limit_bytes) derived from the actual chip."""
    try:
        phys = int(pltpu.get_tpu_info().vmem_capacity_bytes)
    except Exception:
        phys = 64 << 20            # conservative: v7x has 64 MiB per TensorCore
    budget = min((phys * 5) // 8, 96 << 20)
    limit = min(phys - (8 << 20), budget + (16 << 20))
    return budget, max(limit, 32 << 20)


def _choose_tiles(n, hw_pad, c_in, c_out, dsize, budget, fixed_bytes, part_quantum):
    """Pick (nb images per step, t spatial lanes per step)."""
    avail = max(budget - fixed_bytes, 1 << 20)
    per_col = 2 * (c_in + c_out) * dsize          # double-buffered in+out per lane column
    t_cap = avail // per_col
    if t_cap >= hw_pad:
        t = hw_pad
    else:
        t = max(part_quantum, (t_cap // part_quantum) * part_quantum)
    nb = 1
    if t == hw_pad:
        # Small feature maps: fold several images into one grid step so each
        # step moves enough bytes to amortize the fixed pipeline overhead.
        step_bytes = (c_in + c_out) * t * dsize
        nb_want = max(1, _STEP_TARGET_BYTES // max(step_bytes, 1))
        nb_cap = max(1, avail // max(2 * step_bytes, 1))
        nb = _largest_divisor_leq(n, min(n, nb_want, nb_cap))
    # v7x shards "parallel" grid axes over 2 TensorCores: ensure >=2 grid steps
    # whenever the problem is splittable (harmless no-op on v5e/v6e).
    steps = (n // nb) * ((hw_pad + t - 1) // t)
    if steps < 2:
        if nb > 1:
            nb = _largest_divisor_leq(n, nb // 2)
        elif t >= 2 * part_quantum:
            t = max(part_quantum, ((t // 2) // part_quantum) * part_quantum)
    return nb, t


def _outconv_vpu_kernel(w_ref, b_ref, x_ref, o_ref):
    """Small-channel path: sublane-dense unrolled VPU FMA.

    w_ref: SMEM (c_out, c_in)        b_ref: SMEM (c_out,)
    x_ref: VMEM (nb, c_in, t8, 128)  o_ref: VMEM (nb, c_out, t8, 128)
    """
    nb, c_in, t8, lanes = x_ref.shape
    c_out = o_ref.shape[1]
    for b in range(nb):
        for o in range(c_out):
            # Bias folded into the accumulator init; single live accumulator,
            # stored as soon as the row is done (no deferred concatenate).
            acc = jnp.full((t8, lanes), b_ref[o], dtype=jnp.float32)
            for c in range(c_in):
                acc = acc + w_ref[o, c] * x_ref[b, c].astype(jnp.float32)
            o_ref[b, o] = acc.astype(o_ref.dtype)


def _outconv_mxu_kernel(w_ref, b_ref, x_ref, o_ref, *, precision):
    """Large-channel path: MXU matmul per (image, spatial tile).

    w_ref: VMEM (c_out, c_in)   b_ref: VMEM (c_out, 1)  [f32]
    x_ref: VMEM (nb, c_in, t)   o_ref: VMEM (nb, c_out, t)
    """
    nb = x_ref.shape[0]
    bias = b_ref[...]
    for b in range(nb):
        acc = jnp.dot(w_ref[...], x_ref[b],
                      precision=precision,
                      preferred_element_type=jnp.float32)
        o_ref[b] = (acc + bias).astype(o_ref.dtype)


@jax.jit
def outconv(x_nchw, weight, bias):
    """1x1 Conv2d forward (PyTorch OutConv).

    x_nchw : (N, C_in, H, W)  -- f32 or bf16 (pass bf16 x/weight upstream for
                                 a ~2x HBM-bound speedup).
    weight : (C_out, C_in) or (C_out, C_in, 1, 1)
    bias   : (C_out,)
    returns: (N, C_out, H, W), same dtype as x.
    """
    n, c_in, h, w = x_nchw.shape
    if weight.ndim == 4:
        weight = weight.reshape(weight.shape[0], weight.shape[1])
    c_out = weight.shape[0]
    hw = h * w
    hw_pad = ((hw + _LANE - 1) // _LANE) * _LANE

    x3 = x_nchw.reshape(n, c_in, hw)          # free reshape: spatial -> lanes
    if hw_pad != hw:
        # Keep stores lane-dense: pad up to a multiple of 128 lanes, slice after.
        x3 = jnp.pad(x3, ((0, 0), (0, 0), (0, hw_pad - hw)))

    dsize = x3.dtype.itemsize
    budget, vmem_limit = _vmem_budget()
    compiler_params = pltpu.CompilerParams(
        dimension_semantics=("parallel", "parallel"),
        vmem_limit_bytes=int(vmem_limit),
    )

    # Tiny channel counts (the typical OutConv: c_out = num_classes) take the
    # VPU path; anything with real channel-mixing work goes to the MXU so the
    # VALU stays free and the kernel remains HBM-bound.
    use_vpu = (c_out <= 8) and (c_in <= 32) and (c_in * c_out <= 6 * (c_in + c_out))

    if use_vpu:
        fixed = 256 << 10   # weights/bias live in SMEM; small VMEM slack only
        nb, t = _choose_tiles(n, hw_pad, c_in, c_out, dsize, budget, fixed,
                              part_quantum=_SUBLANE * _LANE)
        t8 = t // _LANE
        n_rows = hw_pad // _LANE
        x4 = x3.reshape(n, c_in, n_rows, _LANE)   # sublane-dense per-channel tiles
        grid = (n // nb, pl.cdiv(n_rows, t8))
        out = pl.pallas_call(
            _outconv_vpu_kernel,
            out_shape=jax.ShapeDtypeStruct((n, c_out, n_rows, _LANE), x3.dtype),
            grid_spec=pltpu.PrefetchScalarGridSpec(
                num_scalar_prefetch=0,
                grid=grid,
                in_specs=[
                    pl.BlockSpec(memory_space=pltpu.MemorySpace.SMEM),   # weight
                    pl.BlockSpec(memory_space=pltpu.MemorySpace.SMEM),   # bias
                    pl.BlockSpec((nb, c_in, t8, _LANE), lambda i, s: (i, 0, s, 0)),
                ],
                out_specs=pl.BlockSpec((nb, c_out, t8, _LANE),
                                       lambda i, s: (i, 0, s, 0)),
            ),
            compiler_params=compiler_params,
        )(weight.astype(jnp.float32), bias.astype(jnp.float32), x4)
        out3 = out.reshape(n, c_out, hw_pad)
    else:
        w_arg = weight.astype(x3.dtype)               # bf16 x => bf16 weight
        b_arg = bias.reshape(c_out, 1).astype(jnp.float32)
        wsize = w_arg.dtype.itemsize
        fixed = 2 * (c_out * c_in * wsize + c_out * 4) + (256 << 10)
        nb, t = _choose_tiles(n, hw_pad, c_in, c_out, dsize, budget, fixed,
                              part_quantum=_LANE)
        grid = (n // nb, pl.cdiv(hw_pad, t))
        precision = lax.Precision.HIGHEST if x3.dtype == jnp.float32 else None
        kernel = functools.partial(_outconv_mxu_kernel, precision=precision)
        out3 = pl.pallas_call(
            kernel,
            out_shape=jax.ShapeDtypeStruct((n, c_out, hw_pad), x3.dtype),
            grid_spec=pltpu.PrefetchScalarGridSpec(
                num_scalar_prefetch=0,
                grid=grid,
                in_specs=[
                    # Constant-index blocks: single-buffer so the weight
                    # footprint isn't doubled in VMEM.
                    pl.BlockSpec((c_out, c_in), lambda i, s: (0, 0),
                                 pipeline_mode=pl.Buffered(1)),
                    pl.BlockSpec((c_out, 1), lambda i, s: (0, 0),
                                 pipeline_mode=pl.Buffered(1)),
                    pl.BlockSpec((nb, c_in, t), lambda i, s: (i, 0, s)),
                ],
                out_specs=pl.BlockSpec((nb, c_out, t), lambda i, s: (i, 0, s)),
            ),
            compiler_params=compiler_params,
        )(w_arg, b_arg, x3)

    if hw_pad != hw:
        out3 = out3[:, :, :hw]
    return out3.reshape(n, c_out, h, w)


def _reference(x, weight, bias):
    return (jnp.einsum("nchw,oc->nohw", x, weight,
                       precision=lax.Precision.HIGHEST)
            + bias[None, :, None, None])


if __name__ == "__main__":
    key = jax.random.PRNGKey(0)
    keys = jax.random.split(key, 9)

    # --- Test 1: typical OutConv sizes (tiny channels -> VPU path) ---
    N, C_IN, C_OUT, H, W = 2, 4, 3, 16, 16
    x = jax.random.normal(keys[0], (N, C_IN, H, W), dtype=jnp.float32)
    wt = jax.random.normal(keys[1], (C_OUT, C_IN), dtype=jnp.float32) * 0.1
    b = jax.random.normal(keys[2], (C_OUT,), dtype=jnp.float32) * 0.1
    y = jax.block_until_ready(outconv(x, wt, b))
    assert y.shape == (N, C_OUT, H, W)
    assert jnp.allclose(y, _reference(x, wt, b), atol=1e-5, rtol=1e-5)

    # --- Test 2: larger channel counts exercise the MXU path ---
    N2, C_IN2, C_OUT2, H2, W2 = 2, 64, 128, 16, 16
    x2 = jax.random.normal(keys[3], (N2, C_IN2, H2, W2), dtype=jnp.float32)
    w2 = jax.random.normal(keys[4], (C_OUT2, C_IN2), dtype=jnp.float32) * 0.1
    b2 = jax.random.normal(keys[5], (C_OUT2,), dtype=jnp.float32) * 0.1
    y2 = jax.block_until_ready(outconv(x2, w2, b2))
    assert y2.shape == (N2, C_OUT2, H2, W2)
    assert jnp.allclose(y2, _reference(x2, w2, b2), atol=1e-3, rtol=1e-3)

    # --- Test 3: H*W not a multiple of 128 (7x7 map) exercises pad/slice ---
    N3, C_IN3, C_OUT3, H3, W3 = 2, 6, 2, 7, 7
    x3_ = jax.random.normal(keys[6], (N3, C_IN3, H3, W3), dtype=jnp.float32)
    w3 = jax.random.normal(keys[7], (C_OUT3, C_IN3), dtype=jnp.float32) * 0.1
    b3 = jax.random.normal(keys[8], (C_OUT3,), dtype=jnp.float32) * 0.1
    y3 = jax.block_until_ready(outconv(x3_, w3, b3))
    assert y3.shape == (N3, C_OUT3, H3, W3)
    assert jnp.allclose(y3, _reference(x3_, w3, b3), atol=1e-5, rtol=1e-5)

    print("KERNEL_OK")
</pallas_src>

<mosaic_0001>
module attributes {stable_mosaic.version = 11 : i64} {
  func.func @_outconv_vpu_kernel(%arg0: i32, %arg1: i32, %arg2: memref<3x4xf32, #tpu.memory_space<smem>>, %arg3: memref<3xf32, #tpu.memory_space<smem>>, %arg4: memref<1x4x2x128xf32, #tpu.memory_space<vmem>>, %arg5: memref<1x3x2x128xf32, #tpu.memory_space<vmem>>) attributes {dimension_semantics = [#tpu.dimension_semantics<parallel>, #tpu.dimension_semantics<parallel>], iteration_bounds = array<i64: 2, 1>, scalar_prefetch = 0 : i64, scratch_operands = 0 : i64, tpu.core_type = #tpu.core_type<tc>, window_params = [{transform_indices = @transform_0, window_bounds = array<i64: 3, 4>}, {transform_indices = @transform_1, window_bounds = array<i64: 3>}, {transform_indices = @transform_2, window_bounds = array<i64: 1, 4, 2, 128>}, {transform_indices = @transform_3, window_bounds = array<i64: 1, 3, 2, 128>}]} {
    %c0 = arith.constant 0 : index
    %0 = memref.load %arg3[%c0] : memref<3xf32, #tpu.memory_space<smem>>
    %1 = vector.broadcast %0 : f32 to vector<2x128xf32>
    %c0_0 = arith.constant 0 : index
    %c0_1 = arith.constant 0 : index
    %2 = memref.load %arg2[%c0_0, %c0_1] : memref<3x4xf32, #tpu.memory_space<smem>>
    %c0_2 = arith.constant 0 : index
    %c0_3 = arith.constant 0 : index
    %c0_4 = arith.constant 0 : index
    %c0_5 = arith.constant 0 : index
    %3 = vector.load %arg4[%c0_2, %c0_3, %c0_4, %c0_5] : memref<1x4x2x128xf32, #tpu.memory_space<vmem>>, vector<1x1x2x128xf32>
    %4 = vector.shape_cast %3 : vector<1x1x2x128xf32> to vector<2x128xf32>
    %5 = vector.broadcast %2 : f32 to vector<2x128xf32>
    %6 = arith.mulf %5, %4 : vector<2x128xf32>
    %7 = arith.addf %1, %6 : vector<2x128xf32>
    %c0_6 = arith.constant 0 : index
    %c1 = arith.constant 1 : index
    %8 = memref.load %arg2[%c0_6, %c1] : memref<3x4xf32, #tpu.memory_space<smem>>
    %c0_7 = arith.constant 0 : index
    %c1_8 = arith.constant 1 : index
    %c0_9 = arith.constant 0 : index
    %c0_10 = arith.constant 0 : index
    %9 = vector.load %arg4[%c0_7, %c1_8, %c0_9, %c0_10] : memref<1x4x2x128xf32, #tpu.memory_space<vmem>>, vector<1x1x2x128xf32>
    %10 = vector.shape_cast %9 : vector<1x1x2x128xf32> to vector<2x128xf32>
    %11 = vector.broadcast %8 : f32 to vector<2x128xf32>
    %12 = arith.mulf %11, %10 : vector<2x128xf32>
    %13 = arith.addf %7, %12 : vector<2x128xf32>
    %c0_11 = arith.constant 0 : index
    %c2 = arith.constant 2 : index
    %14 = memref.load %arg2[%c0_11, %c2] : memref<3x4xf32, #tpu.memory_space<smem>>
    %c0_12 = arith.constant 0 : index
    %c2_13 = arith.constant 2 : index
    %c0_14 = arith.constant 0 : index
    %c0_15 = arith.constant 0 : index
    %15 = vector.load %arg4[%c0_12, %c2_13, %c0_14, %c0_15] : memref<1x4x2x128xf32, #tpu.memory_space<vmem>>, vector<1x1x2x128xf32>
    %16 = vector.shape_cast %15 : vector<1x1x2x128xf32> to vector<2x128xf32>
    %17 = vector.broadcast %14 : f32 to vector<2x128xf32>
    %18 = arith.mulf %17, %16 : vector<2x128xf32>
    %19 = arith.addf %13, %18 : vector<2x128xf32>
    %c0_16 = arith.constant 0 : index
    %c3 = arith.constant 3 : index
    %20 = memref.load %arg2[%c0_16, %c3] : memref<3x4xf32, #tpu.memory_space<smem>>
    %c0_17 = arith.constant 0 : index
    %c3_18 = arith.constant 3 : index
    %c0_19 = arith.constant 0 : index
    %c0_20 = arith.constant 0 : index
    %21 = vector.load %arg4[%c0_17, %c3_18, %c0_19, %c0_20] : memref<1x4x2x128xf32, #tpu.memory_space<vmem>>, vector<1x1x2x128xf32>
    %22 = vector.shape_cast %21 : vector<1x1x2x128xf32> to vector<2x128xf32>
    %23 = vector.broadcast %20 : f32 to vector<2x128xf32>
    %24 = arith.mulf %23, %22 : vector<2x128xf32>
    %25 = arith.addf %19, %24 : vector<2x128xf32>
    %c0_21 = arith.constant 0 : index
    %c0_22 = arith.constant 0 : index
    %c0_23 = arith.constant 0 : index
    %c0_24 = arith.constant 0 : index
    %26 = vector.load %arg5[%c0_21, %c0_22, %c0_23, %c0_24] : memref<1x3x2x128xf32, #tpu.memory_space<vmem>>, vector<1x1x2x128xf32>
    %27 = vector.shape_cast %26 : vector<1x1x2x128xf32> to vector<2x128xf32>
    %28 = vector.shape_cast %25 : vector<2x128xf32> to vector<1x1x2x128xf32>
    tpu.vector_store %arg5[%c0_21, %c0_22, %c0_23, %c0_24], %28 {strides = array<i32>} : memref<1x3x2x128xf32, #tpu.memory_space<vmem>>, vector<1x1x2x128xf32>,
    %c1_25 = arith.constant 1 : index
    %29 = memref.load %arg3[%c1_25] : memref<3xf32, #tpu.memory_space<smem>>
    %30 = vector.broadcast %29 : f32 to vector<2x128xf32>
    %c1_26 = arith.constant 1 : index
    %c0_27 = arith.constant 0 : index
    %31 = memref.load %arg2[%c1_26, %c0_27] : memref<3x4xf32, #tpu.memory_space<smem>>
    %c0_28 = arith.constant 0 : index
    %c0_29 = arith.constant 0 : index
    %c0_30 = arith.constant 0 : index
    %c0_31 = arith.constant 0 : index
    %32 = vector.load %arg4[%c0_28, %c0_29, %c0_30, %c0_31] : memref<1x4x2x128xf32, #tpu.memory_space<vmem>>, vector<1x1x2x128xf32>
    %33 = vector.shape_cast %32 : vector<1x1x2x128xf32> to vector<2x128xf32>
    %34 = vector.broadcast %31 : f32 to vector<2x128xf32>
    %35 = arith.mulf %34, %33 : vector<2x128xf32>
    %36 = arith.addf %30, %35 : vector<2x128xf32>
    %c1_32 = arith.constant 1 : index
    %c1_33 = arith.constant 1 : index
    %37 = memref.load %arg2[%c1_32, %c1_33] : memref<3x4xf32, #tpu.memory_space<smem>>
    %c0_34 = arith.constant 0 : index
    %c1_35 = arith.constant 1 : index
    %c0_36 = arith.constant 0 : index
    %c0_37 = arith.constant 0 : index
    %38 = vector.load %arg4[%c0_34, %c1_35, %c0_36, %c0_37] : memref<1x4x2x128xf32, #tpu.memory_space<vmem>>, vector<1x1x2x128xf32>
    %39 = vector.shape_cast %38 : vector<1x1x2x128xf32> to vector<2x128xf32>
    %40 = vector.broadcast %37 : f32 to vector<2x128xf32>
    %41 = arith.mulf %40, %39 : vector<2x128xf32>
    %42 = arith.addf %36, %41 : vector<2x128xf32>
    %c1_38 = arith.constant 1 : index
    %c2_39 = arith.constant 2 : index
    %43 = memref.load %arg2[%c1_38, %c2_39] : memref<3x4xf32, #tpu.memory_space<smem>>
    %c0_40 = arith.constant 0 : index
    %c2_41 = arith.constant 2 : index
    %c0_42 = arith.constant 0 : index
    %c0_43 = arith.constant 0 : index
    %44 = vector.load %arg4[%c0_40, %c2_41, %c0_42, %c0_43] : memref<1x4x2x128xf32, #tpu.memory_space<vmem>>, vector<1x1x2x128xf32>
    %45 = vector.shape_cast %44 : vector<1x1x2x128xf32> to vector<2x128xf32>
    %46 = vector.broadcast %43 : f32 to vector<2x128xf32>
    %47 = arith.mulf %46, %45 : vector<2x128xf32>
    %48 = arith.addf %42, %47 : vector<2x128xf32>
    %c1_44 = arith.constant 1 : index
    %c3_45 = arith.constant 3 : index
    %49 = memref.load %arg2[%c1_44, %c3_45] : memref<3x4xf32, #tpu.memory_space<smem>>
    %c0_46 = arith.constant 0 : index
    %c3_47 = arith.constant 3 : index
    %c0_48 = arith.constant 0 : index
    %c0_49 = arith.constant 0 : index
    %50 = vector.load %arg4[%c0_46, %c3_47, %c0_48, %c0_49] : memref<1x4x2x128xf32, #tpu.memory_space<vmem>>, vector<1x1x2x128xf32>
    %51 = vector.shape_cast %50 : vector<1x1x2x128xf32> to vector<2x128xf32>
    %52 = vector.broadcast %49 : f32 to vector<2x128xf32>
    %53 = arith.mulf %52, %51 : vector<2x128xf32>
    %54 = arith.addf %48, %53 : vector<2x128xf32>
    %c0_50 = arith.constant 0 : index
    %c1_51 = arith.constant 1 : index
    %c0_52 = arith.constant 0 : index
    %c0_53 = arith.constant 0 : index
    %55 = vector.load %arg5[%c0_50, %c1_51, %c0_52, %c0_53] : memref<1x3x2x128xf32, #tpu.memory_space<vmem>>, vector<1x1x2x128xf32>
    %56 = vector.shape_cast %55 : vector<1x1x2x128xf32> to vector<2x128xf32>
    %57 = vector.shape_cast %54 : vector<2x128xf32> to vector<1x1x2x128xf32>
    tpu.vector_store %arg5[%c0_50, %c1_51, %c0_52, %c0_53], %57 {strides = array<i32>} : memref<1x3x2x128xf32, #tpu.memory_space<vmem>>, vector<1x1x2x128xf32>,
    %c2_54 = arith.constant 2 : index
    %58 = memref.load %arg3[%c2_54] : memref<3xf32, #tpu.memory_space<smem>>
    %59 = vector.broadcast %58 : f32 to vector<2x128xf32>
    %c2_55 = arith.constant 2 : index
    %c0_56 = arith.constant 0 : index
    %60 = memref.load %arg2[%c2_55, %c0_56] : memref<3x4xf32, #tpu.memory_space<smem>>
    %c0_57 = arith.constant 0 : index
    %c0_58 = arith.constant 0 : index
    %c0_59 = arith.constant 0 : index
    %c0_60 = arith.constant 0 : index
    %61 = vector.load %arg4[%c0_57, %c0_58, %c0_59, %c0_60] : memref<1x4x2x128xf32, #tpu.memory_space<vmem>>, vector<1x1x2x128xf32>
    %62 = vector.shape_cast %61 : vector<1x1x2x128xf32> to vector<2x128xf32>
    %63 = vector.broadcast %60 : f32 to vector<2x128xf32>
    %64 = arith.mulf %63, %62 : vector<2x128xf32>
    %65 = arith.addf %59, %64 : vector<2x128xf32>
    %c2_61 = arith.constant 2 : index
    %c1_62 = arith.constant 1 : index
    %66 = memref.load %arg2[%c2_61, %c1_62] : memref<3x4xf32, #tpu.memory_space<smem>>
    %c0_63 = arith.constant 0 : index
    %c1_64 = arith.constant 1 : index
    %c0_65 = arith.constant 0 : index
    %c0_66 = arith.constant 0 : index
    %67 = vector.load %arg4[%c0_63, %c1_64, %c0_65, %c0_66] : memref<1x4x2x128xf32, #tpu.memory_space<vmem>>, vector<1x1x2x128xf32>
    %68 = vector.shape_cast %67 : vector<1x1x2x128xf32> to vector<2x128xf32>
    %69 = vector.broadcast %66 : f32 to vector<2x128xf32>
    %70 = arith.mulf %69, %68 : vector<2x128xf32>
    %71 = arith.addf %65, %70 : vector<2x128xf32>
    %c2_67 = arith.constant 2 : index
    %c2_68 = arith.constant 2 : index
    %72 = memref.load %arg2[%c2_67, %c2_68] : memref<3x4xf32, #tpu.memory_space<smem>>
    %c0_69 = arith.constant 0 : index
    %c2_70 = arith.constant 2 : index
    %c0_71 = arith.constant 0 : index
    %c0_72 = arith.constant 0 : index
    %73 = vector.load %arg4[%c0_69, %c2_70, %c0_71, %c0_72] : memref<1x4x2x128xf32, #tpu.memory_space<vmem>>, vector<1x1x2x128xf32>
    %74 = vector.shape_cast %73 : vector<1x1x2x128xf32> to vector<2x128xf32>
    %75 = vector.broadcast %72 : f32 to vector<2x128xf32>
    %76 = arith.mulf %75, %74 : vector<2x128xf32>
    %77 = arith.addf %71, %76 : vector<2x128xf32>
    %c2_73 = arith.constant 2 : index
    %c3_74 = arith.constant 3 : index
    %78 = memref.load %arg2[%c2_73, %c3_74] : memref<3x4xf32, #tpu.memory_space<smem>>
    %c0_75 = arith.constant 0 : index
    %c3_76 = arith.constant 3 : index
    %c0_77 = arith.constant 0 : index
    %c0_78 = arith.constant 0 : index
    %79 = vector.load %arg4[%c0_75, %c3_76, %c0_77, %c0_78] : memref<1x4x2x128xf32, #tpu.memory_space<vmem>>, vector<1x1x2x128xf32>
    %80 = vector.shape_cast %79 : vector<1x1x2x128xf32> to vector<2x128xf32>
    %81 = vector.broadcast %78 : f32 to vector<2x128xf32>
    %82 = arith.mulf %81, %80 : vector<2x128xf32>
    %83 = arith.addf %77, %82 : vector<2x128xf32>
    %c0_79 = arith.constant 0 : index
    %c2_80 = arith.constant 2 : index
    %c0_81 = arith.constant 0 : index
    %c0_82 = arith.constant 0 : index
    %84 = vector.load %arg5[%c0_79, %c2_80, %c0_81, %c0_82] : memref<1x3x2x128xf32, #tpu.memory_space<vmem>>, vector<1x1x2x128xf32>
    %85 = vector.shape_cast %84 : vector<1x1x2x128xf32> to vector<2x128xf32>
    %86 = vector.shape_cast %83 : vector<2x128xf32> to vector<1x1x2x128xf32>
    tpu.vector_store %arg5[%c0_79, %c2_80, %c0_81, %c0_82], %86 {strides = array<i32>} : memref<1x3x2x128xf32, #tpu.memory_space<vmem>>, vector<1x1x2x128xf32>,
    return
  }
  func.func @transform_0(%arg0: i32, %arg1: i32) -> (i32, i32) {
    %c0_i32 = arith.constant 0 : i32
    %c0_i32_0 = arith.constant 0 : i32
    %c0_i32_1 = arith.constant 0 : i32
    return %c0_i32, %c0_i32_0 : i32, i32
  }
  func.func @transform_1(%arg0: i32, %arg1: i32) -> i32 {
    %c0_i32 = arith.constant 0 : i32
    %c0_i32_0 = arith.constant 0 : i32
    return %c0_i32 : i32
  }
  func.func @transform_2(%arg0: i32, %arg1: i32) -> (i32, i32, i32, i32) {
    %c0_i32 = arith.constant 0 : i32
    %c0_i32_0 = arith.constant 0 : i32
    %c0_i32_1 = arith.constant 0 : i32
    return %arg0, %c0_i32, %arg1, %c0_i32_0 : i32, i32, i32, i32
  }
  func.func @transform_3(%arg0: i32, %arg1: i32) -> (i32, i32, i32, i32) {
    %c0_i32 = arith.constant 0 : i32
    %c0_i32_0 = arith.constant 0 : i32
    %c0_i32_1 = arith.constant 0 : i32
    return %arg0, %c0_i32, %arg1, %c0_i32_0 : i32, i32, i32, i32
  }
}

</mosaic_0001>

<bundles_post_ra>
// kernel: outconv.1
= control target key start
LH: loop header
LB: loop body
LE: loop exit
PB: predicated region body
PF: predicated region fallthrough
CT: control target
= control target key end

     0   :  { %8 = vsyncpa [#allocation3], 0  ;;  %s665_s0 = inlined_call_operand.vmem [shape: f32[3,4], index: 0, kind: input, shape index: {}]   ;;  %s666_s1 = inlined_call_operand.vmem [shape: f32[3], index: 1, kind: input, shape index: {}]   ;;  %s667_s2 = inlined_call_operand.vmem [shape: f32[2,4,2,128], index: 2, kind: input, shape index: {}]   ;;  %s668_s3 = inlined_call_operand.vmem [shape: f32[2,3,2,128], index: 3, kind: output, shape index: {}]  }
   0x1   :  { %9 = vsyncpa [#allocation5], 0  ;;  %s578_s12 = smov 0   ;;  %s580_s13 = smov 0  }
   0x2   :  { %s582_s14 = smov 0  }
   0x3 LB: > { %s409_s15 = sadd.s32 4294967295, %s554_s14   ;;  %s27_s16 = sadd.s32 1, %s550_s13  ;;  %s554_s14 = sphi %s582_s14, %s15_s14   ;;  %s550_s13 = sphi %s580_s13, %s671_s13   ;;  %s546_s12 = sphi %s578_s12, %s670_s12  }
   0x4   : > { %p29_p0 = scmp.ge.s32.totalorder %s27_s16, 2  ;;  %p411_p1 = scmp.ge.s32.totalorder %s554_s14, 1 }
   0x5   : > { %p130_p2 = scmp.lt.s32.totalorder %s554_s14, 3  ;;  %p599_p4 = scmp.eq.s32.totalorder %s409_s15, 0 }
   0x6   : > { %s673_s16 = smov (%p29_p0, %s27_s16), 0  ;;  %s142_s20 = sshll.u32 %s665_s0, 4  ;;  %s143_s20 = int_to_ptr.vmem [resolvable:$true] %s142_s20 }
   0x7   : > { %p131_p3 = pnand %p411_p1, %p130_p2  ;;  %s152_s23 = sshll.u32 %s666_s1, 4  ;;  %s153_s23 = int_to_ptr.vmem [resolvable:$true] %s152_s23 }
   0x8   : > { %s556_s24 = smov [#allocation2]   ;;  %s557_s25 = smov [#allocation4]  }
   0x9   : > { %p457_p5 = pneg %p131_p3 }
   0xa   : > { %176 = sbr.rel (%p131_p3) target bundleno = 49 (0x31), region = 32 }
   0xb   : > { %p458_p6 = pnand %p599_p4, %p457_p5 }
   0xd   : > { %460 = dma.vmem_to_smem (!%p458_p6), %s143_s20, 64, %s556_s24, [#allocation3]  }
   0xe   : > { %463 = dma.vmem_to_smem (!%p458_p6), %s153_s23, 16, %s557_s25, [#allocation5]  }
   0xf   : > { %537 = dma.done.wait (%p599_p4), [#allocation3], 64  }
  0x10   : > { %539 = vsyncadd (%p599_p4), [#allocation3], 4294967232 }
  0x11   : > { %541 = dma.done.wait (%p599_p4), [#allocation5], 16  }
  0x12   : > { %543 = vsyncadd (%p599_p4), [#allocation5], 4294967280 }
  0x13   : > { %188 = sfence }
  0x14   : > { %p213_p7 = scmp.lt.s32.totalorder %s546_s12, 1  ;;  %s229_s26 = sld [smem:[#allocation4]] }
  0x15   : > { %s231_s27 = sld [smem:[#allocation2]] }
  0x16   : > { %s675_s12 = smov (!%p213_p7, %s546_s12), 1  ;;  %s421_s28 = sld [smem:[#allocation2 + $0x1]] }
  0x17   : > { %s447_s29 = sshll.u32 %s675_s12, 3  ;;  %s423_s6 = sld [smem:[#allocation2 + $0x2]] }
  0x18   : > { %s627_s5 = scalar_lea.vmem %s667_s2, %s447_s29  ;;  %s425_s7 = sld [smem:[#allocation2 + $0x3]] }
  0x19   : > { %v232_v0 = vld [vmem:[%s627_s5] sm:$0x3]  ;;  %v422_v3 = vld [vmem:[%s627_s5 + $0x2] sm:$0x3]  ;;  %s631_s8 = sld [smem:[#allocation4 + $0x1]]  ;;  %s448_s11 = smul.u32 6, %s675_s12 }
  0x1a   : > { %v230_v1 = vstv %s229_s26  ;;  %v424_v6 = vld [vmem:[%s627_s5 + $0x4] sm:$0x3]  ;;  %s428_s9 = sld [smem:[#allocation2 + $0x80]]  ;;  %v426_v10 = vld [vmem:[%s627_s5 + $0x6] sm:$0x3] }
  0x1b   : > { %v233_v2 = vstv %s231_s27  ;;  %s429_s10 = sld [smem:[#allocation2 + $0x81]]  ;;  %v258_v14 = vld [vmem:[%s627_s5] sm:$0x3]  ;;  %v430_v17 = vld [vmem:[%s627_s5 + $0x2] sm:$0x3]  ;;  %s643_s12 = scalar_lea.vmem %s668_s3, %s448_s11 }
  0x1c   : > { %v234_v4 = vmul.f32 %v233_v2, %v232_v0  ;;  %v239_v5 = vstv %s421_s28  ;;  %s431_s15 = sld [smem:[#allocation2 + $0x82]]  ;;  %v432_v20 = vld [vmem:[%s627_s5 + $0x4] sm:$0x3]  ;;  %v434_v26 = vld [vmem:[%s627_s5 + $0x6] sm:$0x3] }
  0x1d   : > { %v240_v8 = vmul.f32 %v422_v3, %v239_v5  ;;  %v245_v9 = vstv %s423_s6  ;;  %s433_s17 = sld [smem:[#allocation2 + $0x83]]  ;;  %v282_v30 = vld [vmem:[%s627_s5] sm:$0x3]  ;;  %v439_v31 = vld [vmem:[%s627_s5 + $0x2] sm:$0x3] }
  0x1e   : > { %v235_v7 = vadd.f32 %v234_v4, %v230_v1  ;;  %v246_v12 = vmul.f32 %v424_v6, %v245_v9  ;;  %v251_v13 = vstv %s425_s7  ;;  %s637_s18 = sld [smem:[#allocation4 + $0x2]]  ;;  %v441_v36 = vld [vmem:[%s627_s5 + $0x4] sm:$0x3]  ;;  %v443_v42 = vld [vmem:[%s627_s5 + $0x6] sm:$0x3] }
  0x1f   : > { %v252_v16 = vmul.f32 %v426_v10, %v251_v13  ;;  %s437_s19 = sld [smem:[#allocation2 + $0x100]]  ;;  %v256_v18 = vstv %s631_s8 }
  0x20   : > { %v241_v11 = vadd.f32 %v240_v8, %v235_v7  ;;  %v259_v19 = vstv %s428_s9  ;;  %s438_s22 = sld [smem:[#allocation2 + $0x101]] }
  0x21   : > { %v260_v22 = vmul.f32 %v259_v19, %v258_v14  ;;  %v264_v23 = vstv %s429_s10  ;;  %s440_s23 = sld [smem:[#allocation2 + $0x102]] }
  0x22   : > { %v247_v15 = vadd.f32 %v246_v12, %v241_v11  ;;  %v265_v24 = vmul.f32 %v430_v17, %v264_v23  ;;  %v269_v25 = vstv %s431_s15  ;;  %s442_s24 = sld [smem:[#allocation2 + $0x103]] }
  0x23   : > { %v261_v27 = vadd.f32 %v260_v22, %v256_v18  ;;  %v270_v28 = vmul.f32 %v432_v20, %v269_v25  ;;  %v274_v29 = vstv %s433_s17 }
  0x24   : > { %v253_v21 = vadd.f32 %v252_v16, %v247_v15  ;;  %v275_v33 = vmul.f32 %v434_v26, %v274_v29  ;;  %v280_v34 = vstv %s637_s18 }
  0x25   : > { %v266_v32 = vadd.f32 %v265_v24, %v261_v27  ;;  %v283_v35 = vstv %s437_s19 }
  0x26   : > { %254 = vst [vmem:[%s643_s12] sm:$0x3] %v253_v21  ;;  %v284_v37 = vmul.f32 %v283_v35, %v282_v30  ;;  %v288_v38 = vstv %s438_s22 }
  0x27   : > { %v271_v39 = vadd.f32 %v270_v28, %v266_v32  ;;  %v289_v40 = vmul.f32 %v439_v31, %v288_v38  ;;  %v293_v41 = vstv %s440_s23 }
  0x28   : > { %v285_v43 = vadd.f32 %v284_v37, %v280_v34  ;;  %v294_v44 = vmul.f32 %v441_v36, %v293_v41  ;;  %v298_v45 = vstv %s442_s24 }
  0x29   : > { %v276_v46 = vadd.f32 %v275_v33, %v271_v39  ;;  %v299_v48 = vmul.f32 %v443_v42, %v298_v45 }
  0x2a   : > { %v290_v47 = vadd.f32 %v289_v40, %v285_v43 }
  0x2b   : > { %435 = vst [vmem:[%s643_s12 + $0x2] sm:$0x3] %v276_v46 }
  0x2c   : > { %v295_v49 = vadd.f32 %v294_v44, %v290_v47 }
  0x2e   : > { %v300_v50 = vadd.f32 %v299_v48, %v295_v49 }
  0x30   : > { %444 = vst [vmem:[%s643_s12 + $0x4] sm:$0x3] %v300_v50 }
  0x31 PF: > { %s15_s14 = sadd.s32 1, %s554_s14   ;;  %s670_s12 = smov %s550_s13 }
  0x32   : > { %p12_p8 = scmp.ge.s32.totalorder %s15_s14, 4   ;;  %s671_s13 = smov %s673_s16 }
  0x34   :  { %14 = sbr.rel (!%p12_p8) target bundleno = 3 (0x3), region = 76 }
  0x39   :  { %330 = vsyncpa [#allocation3], 1 }
  0x3a   :  { %332 = vsyncpa [#allocation3 + $0x1], 1 }
  0x3b   :  { %333 = vsyncpa [#allocation5], 1 }

</bundles_post_ra>
